<compile_context>
chip_gen: v5e
topology: v5e:2x2
jax: 0.10.0
libtpu: 0.0.40
codegen_flags: <defaults>
</compile_context>

<pallas_src>
import jax
import jax.numpy as jnp
from jax.experimental import pallas as pl
from jax.experimental.pallas import tpu as pltpu


def _atten_kernel(vt_ref, mv_ref, w1t_ref, s1_ref, c1_ref, w2t_ref, b2_ref,
                  w3_ref, b3_ref, vatt_ref, wts_ref):
    B, R, D = vt_ref.shape
    E = w1t_ref.shape[1]

    v3 = vt_ref[...]                                                    # (B, R, D)
    v2 = v3.reshape(B * R, D)

    # embedding_1: fc1 -> folded BatchNorm1d(num_regions) -> tanh.
    # One (B*R, D) @ (D, E) matmul instead of B tiny per-sample pushes.
    # TODO(synk): Dropout layers omitted (eval-mode forward, identity).
    z = jnp.dot(v2, w1t_ref[...], preferred_element_type=jnp.float32)   # (B*R, E)
    wv = jnp.tanh(z.reshape(B, R, E) * s1_ref[...][None]
                  + c1_ref[...][None])                                   # (B, R, E)

    # embedding_2 / embedding_2_2: fc2 -> BatchNorm1d(embed_dim) -> tanh
    # (BN folded into w2t_ref / b2_ref outside), whole batch in one matmul.
    wvm = jnp.tanh(jnp.dot(mv_ref[...], w2t_ref[...],
                           preferred_element_type=jnp.float32)
                   + b2_ref[...])                                        # (B, E)

    # h_v = W_v * W_v_m ; a_v = fc3(h_v).squeeze(2), laid out (B, R) lane-dense.
    h = wv * wvm[:, None, :]                                             # (B, R, E)
    logits = jnp.sum(h * w3_ref[...][None], axis=-1) + b3_ref[0]         # (B, R)

    # softmax over regions (torch dim=1), numerically stable.
    logits = logits - jnp.max(logits, axis=-1, keepdims=True)
    e = jnp.exp(logits)
    weights = e / jnp.sum(e, axis=-1, keepdims=True)                     # (B, R)

    # attention-weighted pooling over regions on the MXU, then l2norm
    # (eps applied inside and outside the sqrt, exactly as the torch l2norm).
    v_att = jnp.einsum("bqr,brd->bqd", weights[:, None, :], v3,
                       preferred_element_type=jnp.float32).reshape(B, D)
    norm = jnp.sqrt(jnp.sum(v_att * v_att, axis=-1, keepdims=True) + 1e-8) + 1e-8
    vatt_ref[...] = v_att / norm
    wts_ref[...] = weights


def v_single_modal_atten(v_t, m_v, params, *, bn_eps=1e-5):
    """Pallas forward of V_single_modal_atten. Returns (v_att, weights)."""
    v_t = v_t.astype(jnp.float32)
    m_v = m_v.astype(jnp.float32)
    B, R, D = v_t.shape
    E = params["w1"].shape[0]
    Dm = m_v.shape[-1]

    # Fold BatchNorm1d(num_regions): per-region scale on the fc1 output, with
    # the fc1 bias folded into the shift -> single FMA inside the kernel.
    s1 = params["bn1_gamma"] / jnp.sqrt(params["bn1_var"] + bn_eps)      # (R,)
    sh1 = params["bn1_beta"] - params["bn1_mean"] * s1                   # (R,)
    c1 = params["b1"][None, :] * s1[:, None] + sh1[:, None]              # (R, E)

    # Branch selection exactly as in the torch forward.
    if Dm == D:
        w2, b2 = params["w2"], params["b2"]
        g2, be2, mu2, var2 = (params["bn2_gamma"], params["bn2_beta"],
                              params["bn2_mean"], params["bn2_var"])
    else:
        w2, b2 = params["w2_2"], params["b2_2"]
        g2, be2, mu2, var2 = (params["bn2_2_gamma"], params["bn2_2_beta"],
                              params["bn2_2_mean"], params["bn2_2_var"])
    s2 = g2 / jnp.sqrt(var2 + bn_eps)
    # Per-feature BN folds exactly into the linear layer.
    w2t_f = (w2.T * s2[None, :]).astype(jnp.float32)                     # (Dm, E)
    b2_f = (b2 * s2 + (be2 - mu2 * s2))[None, :].astype(jnp.float32)     # (1, E)

    args = (
        v_t,                                         # (B, R, D)
        m_v,                                         # (B, Dm)
        params["w1"].T.astype(jnp.float32),          # (D, E)
        s1[:, None].astype(jnp.float32),             # (R, 1)
        c1.astype(jnp.float32),                      # (R, E)
        w2t_f,                                       # (Dm, E)
        b2_f,                                        # (1, E)
        params["w3"].astype(jnp.float32),            # (1, E)
        params["b3"].astype(jnp.float32),            # (1,) scalar in SMEM
    )

    in_specs = [
        pl.BlockSpec((B, R, D), lambda i: (0, 0, 0)),
        pl.BlockSpec((B, Dm), lambda i: (0, 0)),
        pl.BlockSpec((D, E), lambda i: (0, 0)),
        pl.BlockSpec((R, 1), lambda i: (0, 0)),
        pl.BlockSpec((R, E), lambda i: (0, 0)),
        pl.BlockSpec((Dm, E), lambda i: (0, 0)),
        pl.BlockSpec((1, E), lambda i: (0, 0)),
        pl.BlockSpec((1, E), lambda i: (0, 0)),
        pl.BlockSpec(memory_space=pltpu.MemorySpace.SMEM),
    ]
    out_specs = (
        pl.BlockSpec((B, D), lambda i: (0, 0)),       # lane-dense batched slab
        pl.BlockSpec((B, R), lambda i: (0, 0)),       # lane-dense batched slab
    )
    out_shape = (
        jax.ShapeDtypeStruct((B, D), jnp.float32),
        jax.ShapeDtypeStruct((B, R), jnp.float32),
    )

    v_att, weights = pl.pallas_call(
        _atten_kernel,
        grid=(1,),
        in_specs=in_specs,
        out_specs=out_specs,
        out_shape=out_shape,
        compiler_params=pltpu.CompilerParams(dimension_semantics=("arbitrary",)),
    )(*args)
    return v_att, weights


def v_single_modal_atten_ref(v_t, m_v, params, *, bn_eps=1e-5):
    """Pure-JAX reference mirroring the PyTorch module in eval mode."""
    hp = jax.lax.Precision.HIGHEST

    def bn(x, g, b, mu, var):
        return (x - mu) / jnp.sqrt(var + bn_eps) * g + b

    w_v = jnp.einsum("brd,ed->bre", v_t, params["w1"], precision=hp) + params["b1"]
    w_v = bn(w_v,
             params["bn1_gamma"][None, :, None], params["bn1_beta"][None, :, None],
             params["bn1_mean"][None, :, None], params["bn1_var"][None, :, None])
    w_v = jnp.tanh(w_v)

    if m_v.shape[-1] == v_t.shape[-1]:
        w2, b2 = params["w2"], params["b2"]
        g2, be2, mu2, var2 = (params["bn2_gamma"], params["bn2_beta"],
                              params["bn2_mean"], params["bn2_var"])
    else:
        w2, b2 = params["w2_2"], params["b2_2"]
        g2, be2, mu2, var2 = (params["bn2_2_gamma"], params["bn2_2_beta"],
                              params["bn2_2_mean"], params["bn2_2_var"])
    w_v_m = jnp.einsum("bd,ed->be", m_v, w2, precision=hp) + b2
    w_v_m = bn(w_v_m, g2[None, :], be2[None, :], mu2[None, :], var2[None, :])
    w_v_m = jnp.tanh(w_v_m)

    h = w_v * w_v_m[:, None, :]
    a = jnp.einsum("bre,e->br", h, params["w3"][0], precision=hp) + params["b3"][0]
    weights = jax.nn.softmax(a, axis=1)
    v_att = jnp.sum(weights[:, :, None] * v_t, axis=1)
    norm = jnp.sqrt(jnp.sum(v_att * v_att, axis=-1, keepdims=True) + 1e-8) + 1e-8
    return v_att / norm, weights


if __name__ == "__main__":
    key = jax.random.PRNGKey(0)
    B, R, D, E = 4, 8, 48, 32  # batch, num_regions, image_dim, embed_dim
    keys = iter(jax.random.split(key, 24))

    def nrm(shape, scale=0.1):
        return scale * jax.random.normal(next(keys), shape, dtype=jnp.float32)

    def unif(shape):
        return jax.random.uniform(next(keys), shape, dtype=jnp.float32,
                                  minval=0.5, maxval=1.5)

    params = {
        "w1": nrm((E, D)), "b1": nrm((E,)),
        "bn1_gamma": unif((R,)), "bn1_beta": nrm((R,)),
        "bn1_mean": nrm((R,)), "bn1_var": unif((R,)),
        "w2": nrm((E, D)), "b2": nrm((E,)),
        "bn2_gamma": unif((E,)), "bn2_beta": nrm((E,)),
        "bn2_mean": nrm((E,)), "bn2_var": unif((E,)),
        "w2_2": nrm((E, E)), "b2_2": nrm((E,)),
        "bn2_2_gamma": unif((E,)), "bn2_2_beta": nrm((E,)),
        "bn2_2_mean": nrm((E,)), "bn2_2_var": unif((E,)),
        "w3": nrm((1, E)), "b3": nrm((1,)),
    }

    v_t = jax.random.normal(next(keys), (B, R, D), dtype=jnp.float32)
    m_v_img = jax.random.normal(next(keys), (B, D), dtype=jnp.float32)    # fc2 branch
    m_v_emb = jax.random.normal(next(keys), (B, E), dtype=jnp.float32)    # fc2_2 branch

    for m_v in (m_v_img, m_v_emb):
        v_att, weights = v_single_modal_atten(v_t, m_v, params)
        v_att, weights = jax.block_until_ready((v_att, weights))
        v_att_ref, weights_ref = v_single_modal_atten_ref(v_t, m_v, params)
        assert jnp.allclose(v_att, v_att_ref, atol=2e-3, rtol=2e-3), (
            "v_att mismatch", float(jnp.max(jnp.abs(v_att - v_att_ref))))
        assert jnp.allclose(weights, weights_ref, atol=2e-3, rtol=2e-3), (
            "weights mismatch", float(jnp.max(jnp.abs(weights - weights_ref))))

    print("KERNEL_OK")
</pallas_src>

<mosaic_0001>
module attributes {stable_mosaic.version = 11 : i64} {
  func.func @_atten_kernel(%arg0: i32, %arg1: memref<4x8x48xf32, #tpu.memory_space<vmem>>, %arg2: memref<4x48xf32, #tpu.memory_space<vmem>>, %arg3: memref<48x32xf32, #tpu.memory_space<vmem>>, %arg4: memref<8x1xf32, #tpu.memory_space<vmem>>, %arg5: memref<8x32xf32, #tpu.memory_space<vmem>>, %arg6: memref<48x32xf32, #tpu.memory_space<vmem>>, %arg7: memref<1x32xf32, #tpu.memory_space<vmem>>, %arg8: memref<1x32xf32, #tpu.memory_space<vmem>>, %arg9: memref<1xf32, #tpu.memory_space<smem>>, %arg10: memref<4x48xf32, #tpu.memory_space<vmem>>, %arg11: memref<4x8xf32, #tpu.memory_space<vmem>>) attributes {dimension_semantics = [#tpu.dimension_semantics<arbitrary>], iteration_bounds = array<i64: 1>, scalar_prefetch = 0 : i64, scratch_operands = 0 : i64, tpu.core_type = #tpu.core_type<tc>, window_params = [{pipeline_mode = #tpu.pipeline_mode<synchronous>, transform_indices = @transform_0, window_bounds = array<i64: 4, 8, 48>}, {pipeline_mode = #tpu.pipeline_mode<synchronous>, transform_indices = @transform_1, window_bounds = array<i64: 4, 48>}, {pipeline_mode = #tpu.pipeline_mode<synchronous>, transform_indices = @transform_2, window_bounds = array<i64: 48, 32>}, {pipeline_mode = #tpu.pipeline_mode<synchronous>, transform_indices = @transform_3, window_bounds = array<i64: 8, 1>}, {pipeline_mode = #tpu.pipeline_mode<synchronous>, transform_indices = @transform_4, window_bounds = array<i64: 8, 32>}, {pipeline_mode = #tpu.pipeline_mode<synchronous>, transform_indices = @transform_5, window_bounds = array<i64: 48, 32>}, {pipeline_mode = #tpu.pipeline_mode<synchronous>, transform_indices = @transform_6, window_bounds = array<i64: 1, 32>}, {pipeline_mode = #tpu.pipeline_mode<synchronous>, transform_indices = @transform_7, window_bounds = array<i64: 1, 32>}, {transform_indices = @transform_8, window_bounds = array<i64: 1>}, {pipeline_mode = #tpu.pipeline_mode<synchronous>, transform_indices = @transform_9, window_bounds = array<i64: 4, 48>}, {pipeline_mode = #tpu.pipeline_mode<synchronous>, transform_indices = @transform_10, window_bounds = array<i64: 4, 8>}]} {
    %c0 = arith.constant 0 : index
    %c0_0 = arith.constant 0 : index
    %c0_1 = arith.constant 0 : index
    %0 = vector.load %arg1[%c0, %c0_0, %c0_1] : memref<4x8x48xf32, #tpu.memory_space<vmem>>, vector<4x8x48xf32>
    %1 = vector.shape_cast %0 : vector<4x8x48xf32> to vector<32x48xf32>
    %c0_2 = arith.constant 0 : index
    %c0_3 = arith.constant 0 : index
    %2 = vector.load %arg3[%c0_2, %c0_3] : memref<48x32xf32, #tpu.memory_space<vmem>>, vector<48x32xf32>
    %cst = arith.constant dense<0.000000e+00> : vector<32x32xf32>
    %3 = tpu.matmul %1, %2, %cst {dimension_numbers = #tpu.dot_dimension_numbers<[1], [0], [0], [1], [0, 0, 1, 1], [], []>} : vector<32x48xf32>, vector<48x32xf32>, vector<32x32xf32> -> vector<32x32xf32>
    %4 = vector.shape_cast %3 : vector<32x32xf32> to vector<4x8x32xf32>
    %c0_4 = arith.constant 0 : index
    %c0_5 = arith.constant 0 : index
    %5 = vector.load %arg4[%c0_4, %c0_5] : memref<8x1xf32, #tpu.memory_space<vmem>>, vector<8x1xf32>
    %6 = vector.shape_cast %5 : vector<8x1xf32> to vector<1x8x1xf32>
    %7 = vector.broadcast %6 : vector<1x8x1xf32> to vector<4x8x32xf32>
    %8 = arith.mulf %4, %7 : vector<4x8x32xf32>
    %c0_6 = arith.constant 0 : index
    %c0_7 = arith.constant 0 : index
    %9 = vector.load %arg5[%c0_6, %c0_7] : memref<8x32xf32, #tpu.memory_space<vmem>>, vector<8x32xf32>
    %10 = vector.shape_cast %9 : vector<8x32xf32> to vector<1x8x32xf32>
    %11 = vector.broadcast %10 : vector<1x8x32xf32> to vector<4x8x32xf32>
    %12 = arith.addf %8, %11 : vector<4x8x32xf32>
    %13 = math.tanh %12 : vector<4x8x32xf32>
    %c0_8 = arith.constant 0 : index
    %c0_9 = arith.constant 0 : index
    %14 = vector.load %arg2[%c0_8, %c0_9] : memref<4x48xf32, #tpu.memory_space<vmem>>, vector<4x48xf32>
    %c0_10 = arith.constant 0 : index
    %c0_11 = arith.constant 0 : index
    %15 = vector.load %arg6[%c0_10, %c0_11] : memref<48x32xf32, #tpu.memory_space<vmem>>, vector<48x32xf32>
    %cst_12 = arith.constant dense<0.000000e+00> : vector<4x32xf32>
    %16 = tpu.matmul %14, %15, %cst_12 {dimension_numbers = #tpu.dot_dimension_numbers<[1], [0], [0], [1], [0, 0, 1, 1], [], []>} : vector<4x48xf32>, vector<48x32xf32>, vector<4x32xf32> -> vector<4x32xf32>
    %c0_13 = arith.constant 0 : index
    %c0_14 = arith.constant 0 : index
    %17 = vector.load %arg7[%c0_13, %c0_14] : memref<1x32xf32, #tpu.memory_space<vmem>>, vector<1x32xf32>
    %18 = vector.broadcast %17 : vector<1x32xf32> to vector<4x32xf32>
    %19 = arith.addf %16, %18 : vector<4x32xf32>
    %20 = math.tanh %19 : vector<4x32xf32>
    %21 = vector.shape_cast %20 : vector<4x32xf32> to vector<4x1x32xf32>
    %22 = vector.broadcast %21 : vector<4x1x32xf32> to vector<4x8x32xf32>
    %23 = arith.mulf %13, %22 : vector<4x8x32xf32>
    %c0_15 = arith.constant 0 : index
    %c0_16 = arith.constant 0 : index
    %24 = vector.load %arg8[%c0_15, %c0_16] : memref<1x32xf32, #tpu.memory_space<vmem>>, vector<1x32xf32>
    %25 = vector.shape_cast %24 : vector<1x32xf32> to vector<1x1x32xf32>
    %26 = vector.broadcast %25 : vector<1x1x32xf32> to vector<4x8x32xf32>
    %27 = arith.mulf %23, %26 : vector<4x8x32xf32>
    %cst_17 = arith.constant dense<0.000000e+00> : vector<4x8xf32>
    %28 = vector.multi_reduction <add>, %27, %cst_17 [2] : vector<4x8x32xf32> to vector<4x8xf32>
    %c0_18 = arith.constant 0 : index
    %29 = memref.load %arg9[%c0_18] : memref<1xf32, #tpu.memory_space<smem>>
    %30 = vector.broadcast %29 : f32 to vector<4x8xf32>
    %31 = arith.addf %28, %30 : vector<4x8xf32>
    %cst_19 = arith.constant dense<0xFF800000> : vector<4xf32>
    %32 = vector.multi_reduction <maximumf>, %31, %cst_19 [1] : vector<4x8xf32> to vector<4xf32>
    %33 = vector.shape_cast %32 : vector<4xf32> to vector<4x1xf32>
    %34 = vector.broadcast %33 : vector<4x1xf32> to vector<4x8xf32>
    %35 = arith.subf %31, %34 : vector<4x8xf32>
    %36 = math.exp %35 : vector<4x8xf32>
    %cst_20 = arith.constant dense<0.000000e+00> : vector<4xf32>
    %37 = vector.multi_reduction <add>, %36, %cst_20 [1] : vector<4x8xf32> to vector<4xf32>
    %38 = vector.shape_cast %37 : vector<4xf32> to vector<4x1xf32>
    %39 = vector.broadcast %38 : vector<4x1xf32> to vector<4x8xf32>
    %40 = arith.divf %36, %39 : vector<4x8xf32>
    %41 = vector.shape_cast %40 : vector<4x8xf32> to vector<4x1x8xf32>
    "tpu.trace_start"() <{level = 10 : i32, message = "bqr,brd->bqd"}> : () -> ()
    %cst_21 = arith.constant dense<0.000000e+00> : vector<4x1x48xf32>
    %42 = tpu.matmul %41, %0, %cst_21 {dimension_numbers = #tpu.dot_dimension_numbers<[2], [1], [1], [2], [0, 0, 0, 1, 1, 2], [0], [0]>} : vector<4x1x8xf32>, vector<4x8x48xf32>, vector<4x1x48xf32> -> vector<4x1x48xf32>
    "tpu.trace_stop"() : () -> ()
    %43 = vector.shape_cast %42 : vector<4x1x48xf32> to vector<4x48xf32>
    %44 = arith.mulf %43, %43 : vector<4x48xf32>
    %cst_22 = arith.constant dense<0.000000e+00> : vector<4xf32>
    %45 = vector.multi_reduction <add>, %44, %cst_22 [1] : vector<4x48xf32> to vector<4xf32>
    %46 = vector.shape_cast %45 : vector<4xf32> to vector<4x1xf32>
    %cst_23 = arith.constant 9.99999993E-9 : f32
    %47 = vector.broadcast %cst_23 : f32 to vector<4x1xf32>
    %48 = arith.addf %46, %47 : vector<4x1xf32>
    %49 = math.sqrt %48 : vector<4x1xf32>
    %cst_24 = arith.constant 9.99999993E-9 : f32
    %50 = vector.broadcast %cst_24 : f32 to vector<4x1xf32>
    %51 = arith.addf %49, %50 : vector<4x1xf32>
    %52 = vector.broadcast %51 : vector<4x1xf32> to vector<4x48xf32>
    %53 = arith.divf %43, %52 : vector<4x48xf32>
    %c0_25 = arith.constant 0 : index
    %c0_26 = arith.constant 0 : index
    %54 = vector.load %arg10[%c0_25, %c0_26] : memref<4x48xf32, #tpu.memory_space<vmem>>, vector<4x48xf32>
    tpu.vector_store %arg10[%c0_25, %c0_26], %53 {strides = array<i32>} : memref<4x48xf32, #tpu.memory_space<vmem>>, vector<4x48xf32>,
    %c0_27 = arith.constant 0 : index
    %c0_28 = arith.constant 0 : index
    %55 = vector.load %arg11[%c0_27, %c0_28] : memref<4x8xf32, #tpu.memory_space<vmem>>, vector<4x8xf32>
    tpu.vector_store %arg11[%c0_27, %c0_28], %40 {strides = array<i32>} : memref<4x8xf32, #tpu.memory_space<vmem>>, vector<4x8xf32>,
    return
  }
  func.func @transform_0(%arg0: i32) -> (i32, i32, i32) {
    %c0_i32 = arith.constant 0 : i32
    %c0_i32_0 = arith.constant 0 : i32
    %c0_i32_1 = arith.constant 0 : i32
    %c0_i32_2 = arith.constant 0 : i32
    return %c0_i32, %c0_i32_0, %c0_i32_1 : i32, i32, i32
  }
  func.func @transform_1(%arg0: i32) -> (i32, i32) {
    %c0_i32 = arith.constant 0 : i32
    %c0_i32_0 = arith.constant 0 : i32
    %c0_i32_1 = arith.constant 0 : i32
    return %c0_i32, %c0_i32_0 : i32, i32
  }
  func.func @transform_2(%arg0: i32) -> (i32, i32) {
    %c0_i32 = arith.constant 0 : i32
    %c0_i32_0 = arith.constant 0 : i32
    %c0_i32_1 = arith.constant 0 : i32
    return %c0_i32, %c0_i32_0 : i32, i32
  }
  func.func @transform_3(%arg0: i32) -> (i32, i32) {
    %c0_i32 = arith.constant 0 : i32
    %c0_i32_0 = arith.constant 0 : i32
    %c0_i32_1 = arith.constant 0 : i32
    return %c0_i32, %c0_i32_0 : i32, i32
  }
  func.func @transform_4(%arg0: i32) -> (i32, i32) {
    %c0_i32 = arith.constant 0 : i32
    %c0_i32_0 = arith.constant 0 : i32
    %c0_i32_1 = arith.constant 0 : i32
    return %c0_i32, %c0_i32_0 : i32, i32
  }
  func.func @transform_5(%arg0: i32) -> (i32, i32) {
    %c0_i32 = arith.constant 0 : i32
    %c0_i32_0 = arith.constant 0 : i32
    %c0_i32_1 = arith.constant 0 : i32
    return %c0_i32, %c0_i32_0 : i32, i32
  }
  func.func @transform_6(%arg0: i32) -> (i32, i32) {
    %c0_i32 = arith.constant 0 : i32
    %c0_i32_0 = arith.constant 0 : i32
    %c0_i32_1 = arith.constant 0 : i32
    return %c0_i32, %c0_i32_0 : i32, i32
  }
  func.func @transform_7(%arg0: i32) -> (i32, i32) {
    %c0_i32 = arith.constant 0 : i32
    %c0_i32_0 = arith.constant 0 : i32
    %c0_i32_1 = arith.constant 0 : i32
    return %c0_i32, %c0_i32_0 : i32, i32
  }
  func.func @transform_8(%arg0: i32) -> i32 {
    %c0_i32 = arith.constant 0 : i32
    %c0_i32_0 = arith.constant 0 : i32
    return %c0_i32 : i32
  }
  func.func @transform_9(%arg0: i32) -> (i32, i32) {
    %c0_i32 = arith.constant 0 : i32
    %c0_i32_0 = arith.constant 0 : i32
    %c0_i32_1 = arith.constant 0 : i32
    return %c0_i32, %c0_i32_0 : i32, i32
  }
  func.func @transform_10(%arg0: i32) -> (i32, i32) {
    %c0_i32 = arith.constant 0 : i32
    %c0_i32_0 = arith.constant 0 : i32
    %c0_i32_1 = arith.constant 0 : i32
    return %c0_i32, %c0_i32_0 : i32, i32
  }
}

</mosaic_0001>

<bundles_post_ra>
// kernel: tpu_custom_call.1
= control target key start
LH: loop header
LB: loop body
LE: loop exit
PB: predicated region body
PF: predicated region fallthrough
CT: control target
= control target key end

     0   :  { %17 = vsyncpa [#allocation4], 0  ;;  %v688_v6 = vmov 0   ;;  %s920_s0 = inlined_call_operand.vmem [shape: f32[4,8,48], index: 0, kind: input, shape index: {}]   ;;  %s921_s1 = inlined_call_operand.vmem [shape: f32[4,48], index: 1, kind: input, shape index: {}]   ;;  %s922_s2 = inlined_call_operand.vmem [shape: f32[48,32], index: 2, kind: input, shape index: {}]   ;;  %s923_s3 = inlined_call_operand.vmem [shape: f32[8,1], index: 3, kind: input, shape index: {}]   ;;  %s924_s4 = inlined_call_operand.vmem [shape: f32[8,32], index: 4, kind: input, shape index: {}]   ;;  %s925_s5 = inlined_call_operand.vmem [shape: f32[48,32], index: 5, kind: input, shape index: {}]   ;;  %s926_s6 = inlined_call_operand.vmem [shape: f32[1,32], index: 6, kind: input, shape index: {}]   ;;  %s927_s7 = inlined_call_operand.vmem [shape: f32[1,32], index: 7, kind: input, shape index: {}]   ;;  %s928_s8 = inlined_call_operand.<no memory space> [shape: f32[1], index: 8, kind: input, shape index: {}]   ;;  %s929_s9 = inlined_call_operand.hbm [shape: f32[4,48], index: 9, kind: output, shape index: {0}]   ;;  %s930_s10 = inlined_call_operand.hbm [shape: f32[4,8], index: 10, kind: output, shape index: {1}]  }
   0x1   :  { %v46_v0 = vld [vmem:[%s922_s2 + $0x28] sm:$0xff]  ;;  %v45_v2 = vld [vmem:[%s922_s2 + $0x20] sm:$0xff]  ;;  %v44_v4 = vld [vmem:[%s922_s2 + $0x18] sm:$0xff]  ;;  %595 = vset.pattern.permute.xlu0 %v688_v6  ;;  %597 = vset.pattern.permute.xlu2 %v688_v6 }
   0x2   :  { %v114_v1 = vld [vmem:[%s925_s5 + $0x28] sm:$0xff]  ;;  %70 = vmatpush.msra.mxu0 %v46_v0  ;;  %v113_v3 = vld [vmem:[%s925_s5 + $0x20] sm:$0xff]  ;;  %v112_v5 = vld [vmem:[%s925_s5 + $0x18] sm:$0xff]  ;;  %596 = vset.pattern.permute.xlu1 %v688_v6 }
   0x3   :  { %132 = vmatpush.msra.mxu1 %v114_v1  ;;  %v43_v7 = vld [vmem:[%s922_s2 + $0x10] sm:$0xff]  ;;  %v42_v9 = vld [vmem:[%s922_s2 + $0x8] sm:$0xff]  ;;  %v37_v11 = vld [vmem:[%s920_s0] sm:$0xff] }
   0x4   :  { %71 = vmatpush.msra.mxu0 %v45_v2  ;;  %v111_v8 = vld [vmem:[%s925_s5 + $0x10] sm:$0xff]  ;;  %v110_v10 = vld [vmem:[%s925_s5 + $0x8] sm:$0xff]  ;;  %v89_v12 = vld [vmem:[%s923_s3] sm:$0xff]  ;;  %347 = vmatpush.msra.mxu2 %v37_v11 }
   0x5   :  { %133 = vmatpush.msra.mxu1 %v113_v3  ;;  %92 = vperm.xlu0 %595, %v89_v12  }
   0x6   :  { %72 = vmatpush.msra.mxu0 %v44_v4 }
   0x7   :  { %134 = vmatpush.msra.mxu1 %v112_v5 }
   0x8   :  { %18 = vsyncpa [#allocation6], 0  ;;  %73 = vmatpush.msra.mxu0 %v43_v7  ;;  %v38_v13 = vld [vmem:[%s920_s0 + $0x8] sm:$0xff]  ;;  %v39_v14 = vld [vmem:[%s920_s0 + $0x10] sm:$0xff]  ;;  %vm47_vm0 = vcmask 392192   ;;  %vm167_vm1 = vcmask 261120   ;;  %v190_v62 = vlaneseq  ;;  %v181_v0 = vstv %s928_s8 }
   0x9   :  { %135 = vmatpush.msra.mxu1 %v111_v8  ;;  %v41_v15 = vld [vmem:[%s922_s2] sm:$0xff]  ;;  %374 = vmatpush.msra.mxu3 %v38_v13  ;;  %v40_v18 = vld [vmem:[%s920_s0 + $0x18] sm:$0xff]  ;;  %vm196_vm2 = vcmask 1041409   ;;  %vm198_vm3 = vcmask 1042434   ;;  %vm200_vm4 = vcmask 1043459   ;;  %vm203_vm5 = vcmask 60416  }
   0xa   :  { %v109_v16 = vld [vmem:[%s925_s5] sm:$0xff]  ;;  %401 = vmatpush.msrb.mxu2 %v39_v14  ;;  %74 = vmatpush.msra.mxu0 %v42_v9  ;;  %v816_v4 = vand.u32 127, %v190_v62  ;;  %s569_s12 = sshll.u32 %s930_s10, 4  ;;  %s690_s10 = smov [#allocation3]   ;;  %s570_s12 = int_to_ptr.hbm [resolvable:$true] %s569_s12 }
   0xb   :  { %136 = vmatpush.msra.mxu1 %v110_v10  ;;  %v108_v17 = vld [vmem:[%s921_s1] sm:$0xf]  ;;  %428 = vmatpush.msrb.mxu3 %v40_v18  ;;  %s556_s13 = sshll.u32 %s690_s10, 4  ;;  %s558_s16 = sshll.u32 %s929_s9, 4  ;;  %s557_s13 = int_to_ptr.vmem [resolvable:$true] %s556_s13  ;;  %s559_s16 = int_to_ptr.hbm [resolvable:$true] %s558_s16 }
   0xc   :  { %75 = vmatpush.msra.mxu0 %v41_v15  ;;  %v598_v19 = vld [vmem:[%s926_s6] ss:$0 sm:$0xff] }
   0xd   :  { %137 = vmatpush.msra.mxu1 %v109_v16  ;;  %583 = vmatmul.msk.f32.vlgmr.msra.gmra.mxu0 %vm47_vm0, %v37_v11  ;;  %v99_v22 = vld [vmem:[%s924_s4] sm:$0xff] }
   0xe   :  { %587 = vmatmul.msk.f32.vlgmr.msra.gmra.mxu1 %vm47_vm0, %v108_v17  ;;  %v599_v31 = vld [vmem:[%s927_s7] ss:$0 sm:$0xff]  ;;  %s689_s7 = smov [#allocation5]  }
   0xf   :  { %s567_s8 = sshll.u32 %s689_s7, 4  ;;  %s568_s8 = int_to_ptr.vmem [resolvable:$true] %s567_s8 }
  0x15   :  { %584 = vmatmul.msk.f32.gmra.mxu0 %vm47_vm0, %v38_v13 }
  0x1d   :  { %585 = vmatmul.msk.f32.gmra.mxu0 %vm47_vm0, %v39_v14 }
  0x25   :  { %586 = vmatmul.msk.f32.gmra.mxu0 %vm47_vm0, %v40_v18 }
  0x77   :  { %v93_v20 = vpop.permute.xlu0 %92 }
  0x8a   :  { %v77_v21 = vpop.f32.mrf.mxu0 }
  0x8b   :  { %v139_v23 = vpop.f32.mrf.mxu1  ;;  %v95_v24 = vmul.f32 %v93_v20, %v77_v21 }
  0x8c   :  { %v140_v25 = vadd.f32 %v598_v19, %v139_v23 }
  0x8d   :  { %v100_v26 = vadd.f32 %v99_v22, %v95_v24 }
  0x8e   :  { %600 = vtanh.f32 %v140_v25 }
  0x8f   :  { %602 = vtanh.f32 %v100_v26 }
  0x92   :  { %v80_v27 = vpop.f32.mrf.mxu0 }
  0x93   :  { %v96_v29 = vmul.f32 %v93_v20, %v80_v27 }
  0x94   :  { %v601_v28 = vpop.eup %600 }
  0x95   :  { %v147_v30 = vperm.slane %v601_v28, 0  ;;  %v603_v32 = vpop.eup %602  ;;  %v101_v33 = vadd.f32 %v99_v22, %v96_v29  ;;  %v144_v35 = vrot.slane %v601_v28, 1  ;;  %v145_v44 = vrot.slane %v601_v28, 2 }
  0x96   :  { %v146_v54 = vrot.slane %v601_v28, 3 }
  0x97   :  { %v155_v34 = vmul.f32 %v603_v32, %v147_v30  ;;  %604 = vtanh.f32 %v101_v33  ;;  %v148_v39 = vperm.slane %v144_v35, 0  ;;  %v149_v48 = vperm.slane %v145_v44, 0 }
  0x98   :  { %v150_v56 = vperm.slane %v146_v54, 0 }
  0x99   :  { %v163_v36 = vmul.f32 %v599_v31, %v155_v34 }
  0x9a   :  { %v83_v37 = vpop.f32.mrf.mxu0 }
  0x9b   :  { %v168_v38 = vsel %vm167_vm1, %v163_v36, 0.0  ;;  %v97_v40 = vmul.f32 %v93_v20, %v83_v37 }
  0x9c   :  { %169 = vadd.xlane.f32.xlu0 %v168_v38 }
  0x9d   :  { %v605_v41 = vpop.eup %604  ;;  %v102_v42 = vadd.f32 %v99_v22, %v97_v40 }
  0x9e   :  { %v156_v43 = vmul.f32 %v605_v41, %v148_v39 }
  0x9f   :  { %606 = vtanh.f32 %v102_v42 }
  0xa0   :  { %v164_v45 = vmul.f32 %v599_v31, %v156_v43 }
  0xa2   :  { %v86_v46 = vpop.f32.mrf.mxu0  ;;  %v171_v47 = vsel %vm167_vm1, %v164_v45, 0.0 }
  0xa3   :  { %v98_v49 = vmul.f32 %v93_v20, %v86_v46  ;;  %172 = vadd.xlane.f32.xlu1 %v171_v47 }
  0xa5   :  { %v607_v50 = vpop.eup %606  ;;  %v103_v51 = vadd.f32 %v99_v22, %v98_v49 }
  0xa6   :  { %v157_v52 = vmul.f32 %v607_v50, %v149_v48 }
  0xa7   :  { %608 = vtanh.f32 %v103_v51 }
  0xa8   :  { %v165_v53 = vmul.f32 %v599_v31, %v157_v52 }
  0xaa   :  { %v174_v55 = vsel %vm167_vm1, %v165_v53, 0.0 }
  0xab   :  { %175 = vadd.xlane.f32.xlu1 %v174_v55 }
  0xad   :  { %v609_v57 = vpop.eup %608 }
  0xae   :  { %v158_v58 = vmul.f32 %v609_v57, %v150_v56 }
  0xb0   :  { %v166_v59 = vmul.f32 %v599_v31, %v158_v58 }
  0xb2   :  { %v177_v60 = vsel %vm167_vm1, %v166_v59, 0.0 }
  0xb3   :  { %178 = vadd.xlane.f32.xlu2 %v177_v60 }
 0x10f   :  { %v170_v1 = vpop.xlane.xlu0 %169 }
 0x110   :  { %v182_v5 = vadd.f32 %v181_v0, %v170_v1 }
 0x112   :  { %v192_v9 = vperm.slane %v182_v5, %v816_v4 }
 0x116   :  { %v173_v61 = vpop.xlane.xlu1 %172 }
 0x117   :  { %v183_v2 = vadd.f32 %v181_v0, %v173_v61 }
 0x119   :  { %v193_v6 = vperm.slane %v183_v2, %v816_v4 }
 0x11b   :  { %v197_v12 = vsel %vm196_vm2, %v193_v6, %v192_v9 }
 0x11e   :  { %v176_v63 = vpop.xlane.xlu1 %175 }
 0x11f   :  { %v184_v3 = vadd.f32 %v181_v0, %v176_v63 }
 0x121   :  { %v194_v7 = vperm.slane %v184_v3, %v816_v4 }
 0x123   :  { %v199_v13 = vsel %vm198_vm3, %v194_v7, %v197_v12 }
 0x126   :  { %v179_v8 = vpop.xlane.xlu2 %178 }
 0x127   :  { %v185_v10 = vadd.f32 %v181_v0, %v179_v8 }
 0x129   :  { %v195_v11 = vperm.slane %v185_v10, %v816_v4 }
 0x12b   :  { %v201_v14 = vsel %vm200_vm4, %v195_v11, %v199_v13 }
 0x12c   :  { %v204_v15 = vsel %vm203_vm5, %v201_v14, -inf }
 0x12d   :  { %205 = vmax.xlane.f32.xlu2 %v204_v15 }
 0x1a0   :  { %v206_v16 = vpop.xlane.xlu2 %205 }
 0x1a1   :  { %v208_v17 = vperm.slane %v206_v16, 0  ;;  %v209_v18 = vperm.slane %v206_v16, 1  ;;  %v211_v19 = vperm.slane %v206_v16, 3  ;;  %v210_v22 = vperm.slane %v206_v16, 2 }
 0x1a3   :  { %v216_v20 = vsub.f32 %v182_v5, %v208_v17  ;;  %v217_v21 = vsub.f32 %v183_v2, %v209_v18  ;;  %v219_v25 = vsub.f32 %v185_v10, %v211_v19  ;;  %v218_v26 = vsub.f32 %v184_v3, %v210_v22 }
 0x1a5   :  { %v220_v23 = vmul.f32 1.442695, %v216_v20  ;;  %v222_v24 = vmul.f32 1.442695, %v217_v21  ;;  %v226_v27 = vmul.f32 1.442695, %v219_v25 }
 0x1a6   :  { %v224_v28 = vmul.f32 1.442695, %v218_v26 }
 0x1a7   :  { %610 = vpow2.f32 %v220_v23 }
 0x1a8   :  { %612 = vpow2.f32 %v222_v24 }
 0x1a9   :  { %614 = vpow2.f32 %v226_v27 }
 0x1aa   :  { %616 = vpow2.f32 %v224_v28 }
 0x1ad   :  { %v826_v29 = vpop.eup %610 }
 0x1ae   :  { %v828_v30 = vpop.eup %612  ;;  %233 = vperm.xlu1 %596, %v826_v29  }
 0x1af   :  { %236 = vperm.xlu2 %597, %v828_v30   ;;  %v832_v31 = vpop.eup %614 }
 0x1b0   :  { %v834_v32 = vpop.eup %616 }
 0x1b6   :  { %242 = vperm.xlu1 %596, %v832_v31  }
 0x1b7   :  { %239 = vperm.xlu2 %597, %v834_v32  }
 0x209   :  { %v237_v33 = vpop.permute.xlu2 %236 }
 0x20a   :  { %v245_v36 = vperm.slane %v237_v33, %v816_v4 }
 0x211   :  { %v240_v37 = vpop.permute.xlu2 %239 }
 0x212   :  { %v246_v39 = vperm.slane %v240_v37, %v816_v4 }
 0x220   :  { %v234_v34 = vpop.permute.xlu1 %233 }
 0x221   :  { %v244_v35 = vperm.slane %v234_v34, %v816_v4 }
 0x223   :  { %v248_v38 = vsel %vm196_vm2, %v245_v36, %v244_v35 }
 0x224   :  { %v249_v42 = vsel %vm198_vm3, %v246_v39, %v248_v38 }
 0x228   :  { %v243_v40 = vpop.permute.xlu1 %242 }
 0x229   :  { %v247_v41 = vperm.slane %v243_v40, %v816_v4 }
 0x22b   :  { %v250_v43 = vsel %vm200_vm4, %v247_v41, %v249_v42 }
 0x22c   :  { %v252_v44 = vsel %vm203_vm5, %v250_v43, 0.0 }
 0x22d   :  { %253 = vadd.xlane.f32.xlu2 %v252_v44 }
 0x2a0   :  { %v254_v45 = vpop.xlane.xlu2 %253 }
 0x2a1   :  { %v256_v46 = vperm.slane %v254_v45, 0  ;;  %v257_v47 = vperm.slane %v254_v45, 1  ;;  %v258_v48 = vperm.slane %v254_v45, 2  ;;  %v846_v49 = vperm.slane %v254_v45, 3 }
 0x2a3   :  { %618 = vrcp.f32 %v256_v46  ;;  %v290_v59 = vand.u32 2147483648, %v257_v47  ;;  %v273_v60 = vand.u32 2147483647, %v256_v46  ;;  %v275_v61 = vand.u32 2147483648, %v256_v46 }
 0x2a4   :  { %620 = vrcp.f32 %v257_v47  ;;  %v288_v2 = vand.u32 2147483647, %v257_v47  ;;  %vm284_vm8 = vweird.f32 %v257_v47  ;;  %vm269_vm9 = vweird.f32 %v256_v46 }
 0x2a5   :  { %622 = vrcp.f32 %v258_v48  ;;  %v291_v7 = vor.u32 1.1754944e-38, %v290_v59  ;;  %vm274_vm11 = vcmp.eq.f32.partialorder %v273_v60, 8.507059e+37  ;;  %v276_v8 = vor.u32 1.1754944e-38, %v275_v61 }
 0x2a6   :  { %624 = vrcp.f32 %v846_v49  ;;  %vm289_vm14 = vcmp.eq.f32.partialorder %v288_v2, 8.507059e+37  ;;  %v305_v14 = vand.u32 2147483648, %v258_v48  ;;  %vm299_vm15 = vweird.f32 %v258_v48 }
 0x2a7   :  { %v303_v17 = vand.u32 2147483647, %v258_v48  ;;  %v320_v24 = vand.u32 2147483648, %v846_v49  ;;  %v318_v26 = vand.u32 2147483647, %v846_v49 }
 0x2a8   :  { %v306_v21 = vor.u32 1.1754944e-38, %v305_v14 }
 0x2a9   :  { %v619_v50 = vpop.eup %618  ;;  %vm304_vm1 = vcmp.eq.f32.partialorder %v303_v17, 8.507059e+37  ;;  %v321_v28 = vor.u32 1.1754944e-38, %v320_v24 }
 0x2aa   :  { %v621_v51 = vpop.eup %620  ;;  %v265_v52 = vmul.f32 %v619_v50, %v256_v46  ;;  %vm270_vm6 = vweird.f32 %v619_v50 }
 0x2ab   :  { %v623_v53 = vpop.eup %622  ;;  %v280_v54 = vmul.f32 %v621_v51, %v257_v47  ;;  %vm285_vm7 = vweird.f32 %v621_v51  ;;  %vm271_vm10 = vmor %vm269_vm9, %vm270_vm6  ;;  %vm319_vm9 = vcmp.eq.f32.partialorder %v318_v26, 8.507059e+37 }
 0x2ac   :  { %v625_v55 = vpop.eup %624  ;;  %v295_v56 = vmul.f32 %v623_v53, %v258_v48  ;;  %v266_v57 = vsub.f32 1.0, %v265_v52  ;;  %vm286_vm12 = vmor %vm284_vm8, %vm285_vm7  ;;  %vm300_vm13 = vweird.f32 %v623_v53  ;;  %vm314_vm7 = vweird.f32 %v846_v49 }
 0x2ad   :  { %v281_v58 = vsub.f32 1.0, %v280_v54  ;;  %v310_v62 = vmul.f32 %v625_v55, %v846_v49  ;;  %vm301_vm0 = vmor %vm299_vm15, %vm300_vm13  ;;  %vm315_vm6 = vweird.f32 %v625_v55 }
 0x2ae   :  { %v267_v63 = vmul.f32 %v619_v50, %v266_v57  ;;  %v296_v0 = vsub.f32 1.0, %v295_v56  ;;  %vm316_vm8 = vmor %vm314_vm7, %vm315_vm6 }
 0x2af   :  { %v282_v1 = vmul.f32 %v621_v51, %v281_v58  ;;  %v311_v11 = vsub.f32 1.0, %v310_v62 }
 0x2b0   :  { %v268_v3 = vadd.f32 %v619_v50, %v267_v63  ;;  %v297_v5 = vmul.f32 %v623_v53, %v296_v0 }
 0x2b1   :  { %v283_v6 = vadd.f32 %v621_v51, %v282_v1  ;;  %v312_v20 = vmul.f32 %v625_v55, %v311_v11 }
 0x2b2   :  { %v272_v9 = vsel %vm271_vm10, %v619_v50, %v268_v3  ;;  %v298_v10 = vadd.f32 %v623_v53, %v297_v5  ;;  %vm329_vm10 = vcmask 64512  }
 0x2b3   :  { %v287_v12 = vsel %vm286_vm12, %v621_v51, %v283_v6  ;;  %v277_v13 = vsel %vm274_vm11, %v276_v8, %v272_v9  ;;  %v313_v23 = vadd.f32 %v625_v55, %v312_v20 }
 0x2b4   :  { %v292_v15 = vsel %vm289_vm14, %v291_v7, %v287_v12  ;;  %v278_v16 = vmul.f32 %v826_v29, %v277_v13  ;;  %v302_v19 = vsel %vm301_vm0, %v623_v53, %v298_v10 }
 0x2b5   :  { %v293_v18 = vmul.f32 %v828_v30, %v292_v15  ;;  %v307_v22 = vsel %vm304_vm1, %v306_v21, %v302_v19  ;;  %v317_v27 = vsel %vm316_vm8, %v625_v55, %v313_v23 }
 0x2b6   :  { %326 = vperm.xlu1 %596, %v278_v16   ;;  %v308_v25 = vmul.f32 %v834_v32, %v307_v22  ;;  %v322_v29 = vsel %vm319_vm9, %v321_v28, %v317_v27 }
 0x2b7   :  { %354 = vperm.xlu0 %595, %v293_v18   ;;  %v323_v30 = vmul.f32 %v832_v31, %v322_v29 }
 0x2be   :  { %381 = vperm.xlu1 %596, %v308_v25  }
 0x2c6   :  { %408 = vperm.xlu1 %596, %v323_v30  }
 0x328   :  { %v327_v33 = vpop.permute.xlu1 %326 }
 0x329   :  { %v355_v34 = vpop.permute.xlu0 %354  ;;  %v328_v35 = vperm.slane %v327_v33, %v816_v4 }
 0x32a   :  { %v356_v32 = vperm.slane %v355_v34, %v816_v4 }
 0x32b   :  { %588 = vmatmul.msk.f32.vlgmr.msra.gmra.mxu2 %vm329_vm10, %v328_v35 }
 0x32c   :  { %589 = vmatmul.msk.f32.vlgmr.msra.gmra.mxu3 %vm329_vm10, %v356_v32  ;;  %v546_v39 = vsel %vm196_vm2, %v356_v32, %v328_v35 }
 0x330   :  { %v382_v36 = vpop.permute.xlu1 %381 }
 0x331   :  { %v383_v37 = vperm.slane %v382_v36, %v816_v4 }
 0x333   :  { %590 = vmatmul.msk.f32.vlgmr.msrb.gmra.mxu2 %vm329_vm10, %v383_v37  ;;  %v547_v31 = vsel %vm198_vm3, %v383_v37, %v546_v39 }
 0x338   :  { %v409_v38 = vpop.permute.xlu1 %408 }
 0x339   :  { %v410_v40 = vperm.slane %v409_v38, %v816_v4 }
 0x33b   :  { %591 = vmatmul.msk.f32.vlgmr.msrb.gmra.mxu3 %vm329_vm10, %v410_v40  ;;  %v548_v41 = vsel %vm200_vm4, %v410_v40, %v547_v31 }
 0x33c   :  { %550 = vst.msk [vmem:[#allocation5] sm:$0xf] %vm203_vm5, %v548_v41  ;;  %vm448_vm5 = vcmask 388096  }
 0x33d   :  { %572 = dma.vmem_to_hbm [thread:$0]  %s568_s8, 64, %s570_s12, [#allocation6]  }
 0x3ae   :  { %v865_v42 = vpop.f32.mrf.mxu2 }
 0x3af   :  { %v867_v43 = vpop.f32.mrf.mxu3  ;;  %v433_v49 = vmul.f32 %v865_v42, %v865_v42 }
 0x3b0   :  { %v434_v45 = vmul.f32 %v867_v43, %v867_v43 }
 0x3b2   :  { %v441_v4 = vrot.slane %v434_v45, 7 }
 0x3b4   :  { %v442_v52 = vsel %vm196_vm2, %v441_v4, %v433_v49 }
 0x3b6   :  { %v869_v44 = vpop.f32.mrf.mxu2 }
 0x3b7   :  { %v435_v46 = vmul.f32 %v869_v44, %v869_v44 }
 0x3b9   :  { %v443_v47 = vrot.slane %v435_v46, 6 }
 0x3bb   :  { %v444_v53 = vsel %vm198_vm3, %v443_v47, %v442_v52 }
 0x3be   :  { %v875_v48 = vpop.f32.mrf.mxu3 }
 0x3bf   :  { %v436_v50 = vmul.f32 %v875_v48, %v875_v48 }
 0x3c1   :  { %v445_v51 = vrot.slane %v436_v50, 5 }
 0x3c3   :  { %v446_v54 = vsel %vm200_vm4, %v445_v51, %v444_v53 }
 0x3c4   :  { %v449_v55 = vsel %vm448_vm5, %v446_v54, 0.0 }
 0x3c5   :  { %450 = vadd.xlane.f32.xlu0 %v449_v55 }
 0x438   :  { %v451_v56 = vpop.xlane.xlu0 %450 }
 0x439   :  { %v452_v57 = vadd.f32 1e-08, %v451_v56 }
 0x43b   :  { %626 = vrsqrt.f32 %v452_v57  ;;  %vm460_vm11 = vcmp.eq.f32.partialorder %v452_v57, inf  ;;  %v463_v1 = vand.u32 2147483648, %v452_v57  ;;  %vm462_vm12 = vcmp.eq.f32.partialorder %v452_v57, 0.0 }
 0x441   :  { %v627_v58 = vpop.eup %626 }
 0x442   :  { %v454_v59 = vmul.f32 %v627_v58, %v452_v57 }
 0x444   :  { %v455_v60 = vmul.f32 %v627_v58, %v454_v59 }
 0x446   :  { %v456_v61 = vmul.f32 0.5, %v455_v60 }
 0x448   :  { %v457_v62 = vsub.f32 1.5, %v456_v61 }
 0x44a   :  { %v458_v63 = vmul.f32 %v627_v58, %v457_v62 }
 0x44c   :  { %v459_v0 = vmul.f32 %v458_v63, %v452_v57 }
 0x44e   :  { %v461_v2 = vsel %vm460_vm11, %v452_v57, %v459_v0 }
 0x44f   :  { %v464_v3 = vsel %vm462_vm12, %v463_v1, %v461_v2 }
 0x450   :  { %v465_v5 = vadd.f32 1e-08, %v464_v3 }
 0x452   :  { %v467_v6 = vrot.slane %v465_v5, 1  ;;  %v468_v7 = vrot.slane %v465_v5, 2  ;;  %628 = vrcp.f32 %v465_v5  ;;  %v469_v8 = vrot.slane %v465_v5, 3 }
 0x453   :  { %v483_v10 = vand.u32 2147483647, %v465_v5  ;;  %v485_v12 = vand.u32 2147483648, %v465_v5  ;;  %vm479_vm13 = vweird.f32 %v465_v5 }
 0x454   :  { %630 = vrcp.f32 %v467_v6  ;;  %vm494_vm14 = vweird.f32 %v467_v6  ;;  %v498_v18 = vand.u32 2147483647, %v467_v6  ;;  %v500_v19 = vand.u32 2147483648, %v467_v6 }
 0x455   :  { %632 = vrcp.f32 %v468_v7  ;;  %vm888_vm15 = vcmp.eq.f32.partialorder %v483_v10, 8.507059e+37  ;;  %v486_v23 = vor.u32 1.1754944e-38, %v485_v12  ;;  %vm509_vm1 = vweird.f32 %v468_v7 }
 0x456   :  { %634 = vrcp.f32 %v469_v8  ;;  %v513_v26 = vand.u32 2147483647, %v468_v7  ;;  %v515_v30 = vand.u32 2147483648, %v468_v7  ;;  %vm897_vm8 = vcmp.eq.f32.partialorder %v498_v18, 8.507059e+37 }
 0x457   :  { %v501_v38 = vor.u32 1.1754944e-38, %v500_v19  ;;  %v530_v39 = vand.u32 2147483648, %v469_v8  ;;  %v528_v41 = vand.u32 2147483647, %v469_v8 }
 0x458   :  { %v629_v9 = vpop.eup %628  ;;  %v516_v46 = vor.u32 1.1754944e-38, %v515_v30 }
 0x459   :  { %v475_v11 = vmul.f32 %v629_v9, %v465_v5  ;;  %vm480_vm0 = vweird.f32 %v629_v9  ;;  %v531_v53 = vor.u32 1.1754944e-38, %v530_v39 }
 0x45a   :  { %v631_v13 = vpop.eup %630  ;;  %vm893_vm7 = vmor %vm479_vm13, %vm480_vm0  ;;  %vm514_vm13 = vcmp.eq.f32.partialorder %v513_v26, 8.507059e+37  ;;  %vm524_vm0 = vweird.f32 %v469_v8 }
 0x45b   :  { %v633_v14 = vpop.eup %632  ;;  %v476_v15 = vsub.f32 1.0, %v475_v11  ;;  %v490_v16 = vmul.f32 %v631_v13, %v467_v6  ;;  %vm495_vm6 = vweird.f32 %v631_v13 }
 0x45c   :  { %v505_v20 = vmul.f32 %v633_v14, %v468_v7  ;;  %v635_v21 = vpop.eup %634  ;;  %vm510_vm9 = vweird.f32 %v633_v14  ;;  %vm496_vm10 = vmor %vm494_vm14, %vm495_vm6 }
 0x45d   :  { %v477_v22 = vmul.f32 %v629_v9, %v476_v15  ;;  %v491_v24 = vsub.f32 1.0, %v490_v16  ;;  %v520_v27 = vmul.f32 %v635_v21, %v469_v8  ;;  %vm525_vm11 = vweird.f32 %v635_v21  ;;  %vm511_vm12 = vmor %vm509_vm1, %vm510_vm9 }
 0x45e   :  { %v506_v25 = vsub.f32 1.0, %v505_v20  ;;  %vm526_vm14 = vmor %vm524_vm0, %vm525_vm11  ;;  %vm529_vm1 = vcmp.eq.f32.partialorder %v528_v41, 8.507059e+37 }
 0x45f   :  { %v478_v28 = vadd.f32 %v629_v9, %v477_v22  ;;  %v492_v29 = vmul.f32 %v631_v13, %v491_v24  ;;  %v521_v32 = vsub.f32 1.0, %v520_v27 }
 0x460   :  { %v507_v35 = vmul.f32 %v633_v14, %v506_v25 }
 0x461   :  { %v482_v36 = vsel %vm893_vm7, %v629_v9, %v478_v28  ;;  %v493_v37 = vadd.f32 %v631_v13, %v492_v29  ;;  %v522_v31 = vmul.f32 %v635_v21, %v521_v32 }
 0x462   :  { %v508_v40 = vadd.f32 %v633_v14, %v507_v35  ;;  %v487_v4 = vsel %vm888_vm15, %v486_v23, %v482_v36 }
 0x463   :  { %v497_v45 = vsel %vm496_vm10, %v631_v13, %v493_v37  ;;  %v523_v50 = vadd.f32 %v635_v21, %v522_v31  ;;  %v488_v56 = vmul.f32 %v487_v4, %v865_v42 }
 0x464   :  { %v502_v47 = vsel %vm897_vm8, %v501_v38, %v497_v45  ;;  %v512_v49 = vsel %vm511_vm12, %v633_v14, %v508_v40 }
 0x465   :  { %v503_v51 = vmul.f32 %v502_v47, %v867_v43  ;;  %v517_v52 = vsel %vm514_vm13, %v516_v46, %v512_v49  ;;  %v527_v55 = vsel %vm526_vm14, %v635_v21, %v523_v50 }
 0x466   :  { %v518_v54 = vmul.f32 %v517_v52, %v869_v44  ;;  %v532_v57 = vsel %vm529_vm1, %v531_v53, %v527_v55 }
 0x467   :  { %v538_v58 = vrot.slane %v503_v51, 7  ;;  %v533_v59 = vmul.f32 %v532_v57, %v875_v48 }
 0x468   :  { %v540_v60 = vrot.slane %v518_v54, 6 }
 0x469   :  { %v539_v43 = vsel %vm196_vm2, %v538_v58, %v488_v56  ;;  %v542_v44 = vrot.slane %v533_v59, 5 }
 0x46a   :  { %v541_v61 = vsel %vm198_vm3, %v540_v60, %v539_v43 }
 0x46b   :  { %v543_v42 = vsel %vm200_vm4, %v542_v44, %v541_v61 }
 0x46c   :  { %545 = vst.msk [vmem:[#allocation3] sm:$0xf] %vm448_vm5, %v543_v42 }
 0x46d   :  { %561 = dma.vmem_to_hbm [thread:$0]  %s557_s13, 64, %s559_s16, [#allocation4]  }
 0x46e   :  { %684 = dma.done.wait [#allocation4], 64  }
 0x46f   :  { %685 = vsyncadd [#allocation4], 4294967232 }
 0x470   :  { %686 = dma.done.wait [#allocation6], 64  }
 0x471   :  { %687 = vsyncadd [#allocation6], 4294967232 }
 0x472   :  { %581 = vsyncpa [#allocation4], 1 }
 0x473   :  { %582 = vsyncpa [#allocation6], 1 }

</bundles_post_ra>
